<compile_context>
chip_gen: v6e
topology: v6e:2x2x1
jax: 0.10.0
libtpu: 0.0.40
codegen_flags: <defaults>
</compile_context>

<pallas_src>
import functools

import jax
import jax.numpy as jnp
import numpy as np
from jax.experimental import pallas as pl
from jax.experimental.pallas import tpu as pltpu


def _permute_rows_kernel(r_ref, perm_ref, x_hbm, o_hbm, buf, in_sem, out_sem,
                         *, size):
    """Per grid step: move `size` rows of one sample, pipelined across steps."""
    b = pl.program_id(0)
    nb = pl.num_programs(0)
    slot = b % 2
    other = 1 - slot

    def start_fetch(s, sl):
        # Gather rows r+perm[i] of sample s into staging slot sl (reads only).
        r = r_ref[s]
        for i in range(size):                       # static, tiny (size=3)
            src = r + perm_ref[s * size + i]
            pltpu.make_async_copy(
                x_hbm.at[s, pl.ds(src, 1), :],
                buf.at[sl, pl.ds(i, 1), :],
                in_sem.at[sl, i]).start()

    def wait_fetch(sl):
        for i in range(size):
            pltpu.make_async_copy(
                x_hbm.at[0, pl.ds(0, 1), :],        # dummy src: shape-only wait
                buf.at[sl, pl.ds(i, 1), :],
                in_sem.at[sl, i]).wait()

    def start_write(s, sl):
        # Scatter staging rows back to rows r..r+size-1 of the aliased output.
        r = r_ref[s]
        for i in range(size):
            pltpu.make_async_copy(
                buf.at[sl, pl.ds(i, 1), :],
                o_hbm.at[s, pl.ds(r + i, 1), :],
                out_sem.at[sl, i]).start()

    def wait_write(sl):
        for i in range(size):
            pltpu.make_async_copy(
                buf.at[sl, pl.ds(i, 1), :],
                o_hbm.at[0, pl.ds(0, 1), :],        # dummy dst: shape-only wait
                out_sem.at[sl, i]).wait()

    # Prime the pipeline: fetch sample 0 into slot 0 on the first step.
    @pl.when(b == 0)
    def _():
        start_fetch(0, 0)

    # Free the other slot: sample b-1's writeback (started last step) must be
    # done before its staging buffer is reused.
    @pl.when(b >= 1)
    def _():
        wait_write(other)

    # Prefetch the next sample; overlaps with this sample's fetch/writeback.
    @pl.when(b + 1 < nb)
    def _():
        start_fetch(b + 1, other)

    # All reads of sample b's window finish before any write to it starts.
    wait_fetch(slot)
    start_write(b, slot)

    # Last sample: drain its own writeback before the kernel returns.
    @pl.when(b == nb - 1)
    def _():
        wait_write(slot)


@functools.partial(jax.jit, static_argnames=("size",), donate_argnums=(0,))
def _permute_batched(xb, r_idx, perm_flat, *, size):
    B, S, D = xb.shape
    kernel = functools.partial(_permute_rows_kernel, size=size)
    return pl.pallas_call(
        kernel,
        out_shape=jax.ShapeDtypeStruct((B, S, D), xb.dtype),
        grid_spec=pltpu.PrefetchScalarGridSpec(
            num_scalar_prefetch=2,                        # r_idx, perm -> SMEM
            grid=(B,),
            in_specs=[pl.BlockSpec(memory_space=pl.ANY)],  # raw HBM ref
            out_specs=pl.BlockSpec(memory_space=pl.ANY),   # raw HBM ref
            scratch_shapes=[
                pltpu.VMEM((2, size, D), xb.dtype),        # double-buffered rows
                pltpu.SemaphoreType.DMA((2, size)),        # fetch sems per slot/row
                pltpu.SemaphoreType.DMA((2, size)),        # write sems per slot/row
            ],
        ),
        # x (input #2, counting the two scalar-prefetch operands) aliases the
        # output: untouched rows are never moved, only the permuted rows are.
        input_output_aliases={2: 0},
        compiler_params=pltpu.CompilerParams(
            dimension_semantics=("arbitrary",)),           # cross-step DMA pipeline
    )(r_idx, perm_flat, xb)


def permute_sequence(sample, key, size=3):
    """Pallas implementation of PermuteSequence.forward.

    Accepts x of shape (S, D) (single sample, like the PyTorch module) or
    (B, S, D) (a batch, amortizing launch / grid-step overhead).
    Returns ((x_out, y), r_idx, perm) so the caller can verify.  x is donated.
    """
    x, y = sample
    single = (x.ndim == 2)
    xb = x[None] if single else x
    B, S, D = xb.shape
    assert S > size, "sequence must be longer than the permuted window"

    k_idx, k_perm = jax.random.split(key)
    # torch.randint(low=0, high=S - size) has an *exclusive* high -> match it.
    r_idx = jax.random.randint(k_idx, (B,), 0, S - size, dtype=jnp.int32)
    # Independent uniform-random permutation of [0, size) per sample.
    perm = jnp.argsort(jax.random.uniform(k_perm, (B, size)), axis=-1)
    perm = perm.astype(jnp.int32)

    x_out = _permute_batched(xb, r_idx, perm.reshape(B * size), size=size)

    if single:
        x_out = x_out[0]
    return (x_out, y), r_idx, perm


if __name__ == "__main__":
    key = jax.random.PRNGKey(0)
    k_x, k_y, k_rand = jax.random.split(key, 3)

    B, SEQ, FEAT, SIZE = 4, 16, 128, 3
    x = jax.random.normal(k_x, (B, SEQ, FEAT), dtype=jnp.float32)
    y = jax.random.normal(k_y, (B,), dtype=jnp.float32)

    # Snapshot x on the host before the call (x is donated / aliased in place).
    x_host = np.asarray(jax.device_get(x))

    (x_out, y_out), r_idx, perm = permute_sequence((x, y), k_rand, size=SIZE)
    x_out = jax.block_until_ready(x_out)

    # Reference: rows outside each window unchanged, window rows permuted.
    r_host = np.asarray(jax.device_get(r_idx))
    p_host = np.asarray(jax.device_get(perm))
    ref = x_host.copy()
    for b in range(B):
        r = int(r_host[b])
        p = p_host[b]
        ref[b, r:r + SIZE, :] = ref[b, r:r + SIZE, :][p, :]

    assert np.allclose(np.asarray(jax.device_get(x_out)), ref), \
        "mismatch vs reference"
    assert np.allclose(np.asarray(jax.device_get(y_out)),
                       np.asarray(jax.device_get(y))), \
        "y must pass through unchanged"

    print("KERNEL_OK")
</pallas_src>

<mosaic_0001>
module attributes {stable_mosaic.version = 11 : i64} {
  func.func @_permute_rows_kernel(%arg0: i32, %arg1: memref<4xi32, #tpu.memory_space<smem>>, %arg2: memref<12xi32, #tpu.memory_space<smem>>, %arg3: memref<4x16x128xf32, #tpu.memory_space<any>>, %arg4: memref<4x16x128xf32, #tpu.memory_space<any>>, %arg5: memref<2x3x128xf32, #tpu.memory_space<vmem>>, %arg6: memref<2x3x!tpu.dma_semaphore, #tpu.memory_space<semaphore_mem>>, %arg7: memref<2x3x!tpu.dma_semaphore, #tpu.memory_space<semaphore_mem>>) attributes {dimension_semantics = [#tpu.dimension_semantics<arbitrary>], iteration_bounds = array<i64: 4>, scalar_prefetch = 2 : i64, scratch_operands = 3 : i64, tpu.core_type = #tpu.core_type<tc>, window_params = [{}, {}]} {
    %c2_i32 = arith.constant 2 : i32
    %c0_i32 = arith.constant 0 : i32
    %0 = arith.cmpi eq, %c2_i32, %c0_i32 : i32
    %c1_i32 = arith.constant 1 : i32
    %1 = arith.select %0, %c1_i32, %c2_i32 : i32
    %2 = arith.remsi %arg0, %1 : i32
    %c0_i32_0 = arith.constant 0 : i32
    %3 = arith.cmpi ne, %2, %c0_i32_0 : i32
    %c0_i32_1 = arith.constant 0 : i32
    %4 = arith.cmpi slt, %2, %c0_i32_1 : i32
    %c0_i32_2 = arith.constant 0 : i32
    %5 = arith.cmpi slt, %1, %c0_i32_2 : i32
    %6 = arith.xori %4, %5 : i1
    %7 = arith.andi %6, %3 : i1
    %8 = arith.addi %2, %1 : i32
    %9 = arith.select %7, %8, %2 : i32
    %c1_i32_3 = arith.constant 1 : i32
    %10 = arith.subi %c1_i32_3, %9 : i32
    %c0_i32_4 = arith.constant 0 : i32
    %11 = arith.cmpi eq, %arg0, %c0_i32_4 : i32
    %12 = arith.extui %11 : i1 to i32
    %c0_i32_5 = arith.constant 0 : i32
    %13 = arith.cmpi ne, %12, %c0_i32_5 : i32
    scf.if %13 {
      %c0 = arith.constant 0 : index
      %65 = memref.load %arg1[%c0] : memref<4xi32, #tpu.memory_space<smem>>
      %c0_44 = arith.constant 0 : index
      %66 = memref.load %arg2[%c0_44] : memref<12xi32, #tpu.memory_space<smem>>
      %67 = arith.addi %65, %66 : i32
      %c0_i32_45 = arith.constant 0 : i32
      %c0_i32_46 = arith.constant 0 : i32
      %c0_i32_47 = arith.constant 0 : i32
      %c0_i32_48 = arith.constant 0 : i32
      %c0_i32_49 = arith.constant 0 : i32
      %68 = tpu.memref_slice %arg3[%c0_i32_45, %67, %c0_i32_49] : memref<4x16x128xf32, #tpu.memory_space<any>> -> memref<1x1x128xf32, #tpu.memory_space<any>>
      %69 = tpu.memref_squeeze %68 : memref<1x1x128xf32, #tpu.memory_space<any>> -> memref<1x128xf32, #tpu.memory_space<any>>
      %c0_i32_50 = arith.constant 0 : i32
      %c0_i32_51 = arith.constant 0 : i32
      %70 = tpu.memref_slice %arg5[%c0_i32_46, %c0_i32_50, %c0_i32_51] : memref<2x3x128xf32, #tpu.memory_space<vmem>> -> memref<1x1x128xf32, #tpu.memory_space<vmem>>
      %71 = tpu.memref_squeeze %70 : memref<1x1x128xf32, #tpu.memory_space<vmem>> -> memref<1x128xf32, #tpu.memory_space<vmem>>
      %72 = tpu.memref_slice %arg6[%c0_i32_47, %c0_i32_48] : memref<2x3x!tpu.dma_semaphore, #tpu.memory_space<semaphore_mem>> -> memref<1x1x!tpu.dma_semaphore, #tpu.memory_space<semaphore_mem>>
      %73 = tpu.memref_squeeze %72 : memref<1x1x!tpu.dma_semaphore, #tpu.memory_space<semaphore_mem>> -> memref<!tpu.dma_semaphore, #tpu.memory_space<semaphore_mem>>
      tpu.enqueue_dma source(%69 : memref<1x128xf32, #tpu.memory_space<any>>) target(%71 : memref<1x128xf32, #tpu.memory_space<vmem>>) target_semaphore(%73 : memref<!tpu.dma_semaphore, #tpu.memory_space<semaphore_mem>>)
      %c1 = arith.constant 1 : index
      %74 = memref.load %arg2[%c1] : memref<12xi32, #tpu.memory_space<smem>>
      %75 = arith.addi %65, %74 : i32
      %c0_i32_52 = arith.constant 0 : i32
      %c0_i32_53 = arith.constant 0 : i32
      %c0_i32_54 = arith.constant 0 : i32
      %c1_i32_55 = arith.constant 1 : i32
      %c0_i32_56 = arith.constant 0 : i32
      %76 = tpu.memref_slice %arg3[%c0_i32_52, %75, %c0_i32_56] : memref<4x16x128xf32, #tpu.memory_space<any>> -> memref<1x1x128xf32, #tpu.memory_space<any>>
      %77 = tpu.memref_squeeze %76 : memref<1x1x128xf32, #tpu.memory_space<any>> -> memref<1x128xf32, #tpu.memory_space<any>>
      %c1_i32_57 = arith.constant 1 : i32
      %c0_i32_58 = arith.constant 0 : i32
      %78 = tpu.memref_slice %arg5[%c0_i32_53, %c1_i32_57, %c0_i32_58] : memref<2x3x128xf32, #tpu.memory_space<vmem>> -> memref<1x1x128xf32, #tpu.memory_space<vmem>>
      %79 = tpu.memref_squeeze %78 : memref<1x1x128xf32, #tpu.memory_space<vmem>> -> memref<1x128xf32, #tpu.memory_space<vmem>>
      %80 = tpu.memref_slice %arg6[%c0_i32_54, %c1_i32_55] : memref<2x3x!tpu.dma_semaphore, #tpu.memory_space<semaphore_mem>> -> memref<1x1x!tpu.dma_semaphore, #tpu.memory_space<semaphore_mem>>
      %81 = tpu.memref_squeeze %80 : memref<1x1x!tpu.dma_semaphore, #tpu.memory_space<semaphore_mem>> -> memref<!tpu.dma_semaphore, #tpu.memory_space<semaphore_mem>>
      tpu.enqueue_dma source(%77 : memref<1x128xf32, #tpu.memory_space<any>>) target(%79 : memref<1x128xf32, #tpu.memory_space<vmem>>) target_semaphore(%81 : memref<!tpu.dma_semaphore, #tpu.memory_space<semaphore_mem>>)
      %c2 = arith.constant 2 : index
      %82 = memref.load %arg2[%c2] : memref<12xi32, #tpu.memory_space<smem>>
      %83 = arith.addi %65, %82 : i32
      %c0_i32_59 = arith.constant 0 : i32
      %c0_i32_60 = arith.constant 0 : i32
      %c0_i32_61 = arith.constant 0 : i32
      %c2_i32_62 = arith.constant 2 : i32
      %c0_i32_63 = arith.constant 0 : i32
      %84 = tpu.memref_slice %arg3[%c0_i32_59, %83, %c0_i32_63] : memref<4x16x128xf32, #tpu.memory_space<any>> -> memref<1x1x128xf32, #tpu.memory_space<any>>
      %85 = tpu.memref_squeeze %84 : memref<1x1x128xf32, #tpu.memory_space<any>> -> memref<1x128xf32, #tpu.memory_space<any>>
      %c2_i32_64 = arith.constant 2 : i32
      %c0_i32_65 = arith.constant 0 : i32
      %86 = tpu.memref_slice %arg5[%c0_i32_60, %c2_i32_64, %c0_i32_65] : memref<2x3x128xf32, #tpu.memory_space<vmem>> -> memref<1x1x128xf32, #tpu.memory_space<vmem>>
      %87 = tpu.memref_squeeze %86 : memref<1x1x128xf32, #tpu.memory_space<vmem>> -> memref<1x128xf32, #tpu.memory_space<vmem>>
      %88 = tpu.memref_slice %arg6[%c0_i32_61, %c2_i32_62] : memref<2x3x!tpu.dma_semaphore, #tpu.memory_space<semaphore_mem>> -> memref<1x1x!tpu.dma_semaphore, #tpu.memory_space<semaphore_mem>>
      %89 = tpu.memref_squeeze %88 : memref<1x1x!tpu.dma_semaphore, #tpu.memory_space<semaphore_mem>> -> memref<!tpu.dma_semaphore, #tpu.memory_space<semaphore_mem>>
      tpu.enqueue_dma source(%85 : memref<1x128xf32, #tpu.memory_space<any>>) target(%87 : memref<1x128xf32, #tpu.memory_space<vmem>>) target_semaphore(%89 : memref<!tpu.dma_semaphore, #tpu.memory_space<semaphore_mem>>)
    } else {
    }
    %c1_i32_6 = arith.constant 1 : i32
    %14 = arith.cmpi sge, %arg0, %c1_i32_6 : i32
    %15 = arith.extui %14 : i1 to i32
    %c0_i32_7 = arith.constant 0 : i32
    %16 = arith.cmpi ne, %15, %c0_i32_7 : i32
    scf.if %16 {
      %c0_i32_44 = arith.constant 0 : i32
      %c0_i32_45 = arith.constant 0 : i32
      %c0_i32_46 = arith.constant 0 : i32
      %c0_i32_47 = arith.constant 0 : i32
      %65 = tpu.memref_slice %arg5[%10, %c0_i32_46, %c0_i32_47] : memref<2x3x128xf32, #tpu.memory_space<vmem>> -> memref<1x1x128xf32, #tpu.memory_space<vmem>>
      %66 = tpu.memref_squeeze %65 : memref<1x1x128xf32, #tpu.memory_space<vmem>> -> memref<1x128xf32, #tpu.memory_space<vmem>>
      %c0_i32_48 = arith.constant 0 : i32
      %c0_i32_49 = arith.constant 0 : i32
      %67 = tpu.memref_slice %arg4[%c0_i32_44, %c0_i32_48, %c0_i32_49] : memref<4x16x128xf32, #tpu.memory_space<any>> -> memref<1x1x128xf32, #tpu.memory_space<any>>
      %68 = tpu.memref_squeeze %67 : memref<1x1x128xf32, #tpu.memory_space<any>> -> memref<1x128xf32, #tpu.memory_space<any>>
      %69 = tpu.memref_slice %arg7[%10, %c0_i32_45] : memref<2x3x!tpu.dma_semaphore, #tpu.memory_space<semaphore_mem>> -> memref<1x1x!tpu.dma_semaphore, #tpu.memory_space<semaphore_mem>>
      %70 = tpu.memref_squeeze %69 : memref<1x1x!tpu.dma_semaphore, #tpu.memory_space<semaphore_mem>> -> memref<!tpu.dma_semaphore, #tpu.memory_space<semaphore_mem>>
      tpu.wait_dma2 semaphore(%70 : memref<!tpu.dma_semaphore, #tpu.memory_space<semaphore_mem>>) src(%66 : memref<1x128xf32, #tpu.memory_space<vmem>>) dst(%68 : memref<1x128xf32, #tpu.memory_space<any>>)
      %c0_i32_50 = arith.constant 0 : i32
      %c1_i32_51 = arith.constant 1 : i32
      %c1_i32_52 = arith.constant 1 : i32
      %c0_i32_53 = arith.constant 0 : i32
      %71 = tpu.memref_slice %arg5[%10, %c1_i32_52, %c0_i32_53] : memref<2x3x128xf32, #tpu.memory_space<vmem>> -> memref<1x1x128xf32, #tpu.memory_space<vmem>>
      %72 = tpu.memref_squeeze %71 : memref<1x1x128xf32, #tpu.memory_space<vmem>> -> memref<1x128xf32, #tpu.memory_space<vmem>>
      %c0_i32_54 = arith.constant 0 : i32
      %c0_i32_55 = arith.constant 0 : i32
      %73 = tpu.memref_slice %arg4[%c0_i32_50, %c0_i32_54, %c0_i32_55] : memref<4x16x128xf32, #tpu.memory_space<any>> -> memref<1x1x128xf32, #tpu.memory_space<any>>
      %74 = tpu.memref_squeeze %73 : memref<1x1x128xf32, #tpu.memory_space<any>> -> memref<1x128xf32, #tpu.memory_space<any>>
      %75 = tpu.memref_slice %arg7[%10, %c1_i32_51] : memref<2x3x!tpu.dma_semaphore, #tpu.memory_space<semaphore_mem>> -> memref<1x1x!tpu.dma_semaphore, #tpu.memory_space<semaphore_mem>>
      %76 = tpu.memref_squeeze %75 : memref<1x1x!tpu.dma_semaphore, #tpu.memory_space<semaphore_mem>> -> memref<!tpu.dma_semaphore, #tpu.memory_space<semaphore_mem>>
      tpu.wait_dma2 semaphore(%76 : memref<!tpu.dma_semaphore, #tpu.memory_space<semaphore_mem>>) src(%72 : memref<1x128xf32, #tpu.memory_space<vmem>>) dst(%74 : memref<1x128xf32, #tpu.memory_space<any>>)
      %c0_i32_56 = arith.constant 0 : i32
      %c2_i32_57 = arith.constant 2 : i32
      %c2_i32_58 = arith.constant 2 : i32
      %c0_i32_59 = arith.constant 0 : i32
      %77 = tpu.memref_slice %arg5[%10, %c2_i32_58, %c0_i32_59] : memref<2x3x128xf32, #tpu.memory_space<vmem>> -> memref<1x1x128xf32, #tpu.memory_space<vmem>>
      %78 = tpu.memref_squeeze %77 : memref<1x1x128xf32, #tpu.memory_space<vmem>> -> memref<1x128xf32, #tpu.memory_space<vmem>>
      %c0_i32_60 = arith.constant 0 : i32
      %c0_i32_61 = arith.constant 0 : i32
      %79 = tpu.memref_slice %arg4[%c0_i32_56, %c0_i32_60, %c0_i32_61] : memref<4x16x128xf32, #tpu.memory_space<any>> -> memref<1x1x128xf32, #tpu.memory_space<any>>
      %80 = tpu.memref_squeeze %79 : memref<1x1x128xf32, #tpu.memory_space<any>> -> memref<1x128xf32, #tpu.memory_space<any>>
      %81 = tpu.memref_slice %arg7[%10, %c2_i32_57] : memref<2x3x!tpu.dma_semaphore, #tpu.memory_space<semaphore_mem>> -> memref<1x1x!tpu.dma_semaphore, #tpu.memory_space<semaphore_mem>>
      %82 = tpu.memref_squeeze %81 : memref<1x1x!tpu.dma_semaphore, #tpu.memory_space<semaphore_mem>> -> memref<!tpu.dma_semaphore, #tpu.memory_space<semaphore_mem>>
      tpu.wait_dma2 semaphore(%82 : memref<!tpu.dma_semaphore, #tpu.memory_space<semaphore_mem>>) src(%78 : memref<1x128xf32, #tpu.memory_space<vmem>>) dst(%80 : memref<1x128xf32, #tpu.memory_space<any>>)
    } else {
    }
    %c1_i32_8 = arith.constant 1 : i32
    %17 = arith.addi %arg0, %c1_i32_8 : i32
    %c4_i32 = arith.constant 4 : i32
    %18 = arith.cmpi slt, %17, %c4_i32 : i32
    %19 = arith.extui %18 : i1 to i32
    %c0_i32_9 = arith.constant 0 : i32
    %20 = arith.cmpi ne, %19, %c0_i32_9 : i32
    scf.if %20 {
      %c1_i32_44 = arith.constant 1 : i32
      %65 = arith.addi %arg0, %c1_i32_44 : i32
      %66 = arith.index_cast %65 : i32 to index
      %67 = memref.load %arg1[%66] : memref<4xi32, #tpu.memory_space<smem>>
      %c3_i32_45 = arith.constant 3 : i32
      %68 = arith.muli %65, %c3_i32_45 : i32
      %c0_i32_46 = arith.constant 0 : i32
      %69 = arith.addi %68, %c0_i32_46 : i32
      %70 = arith.index_cast %69 : i32 to index
      %71 = memref.load %arg2[%70] : memref<12xi32, #tpu.memory_space<smem>>
      %72 = arith.addi %67, %71 : i32
      %c0_i32_47 = arith.constant 0 : i32
      %c0_i32_48 = arith.constant 0 : i32
      %73 = tpu.memref_slice %arg3[%65, %72, %c0_i32_48] : memref<4x16x128xf32, #tpu.memory_space<any>> -> memref<1x1x128xf32, #tpu.memory_space<any>>
      %74 = tpu.memref_squeeze %73 : memref<1x1x128xf32, #tpu.memory_space<any>> -> memref<1x128xf32, #tpu.memory_space<any>>
      %c0_i32_49 = arith.constant 0 : i32
      %c0_i32_50 = arith.constant 0 : i32
      %75 = tpu.memref_slice %arg5[%10, %c0_i32_49, %c0_i32_50] : memref<2x3x128xf32, #tpu.memory_space<vmem>> -> memref<1x1x128xf32, #tpu.memory_space<vmem>>
      %76 = tpu.memref_squeeze %75 : memref<1x1x128xf32, #tpu.memory_space<vmem>> -> memref<1x128xf32, #tpu.memory_space<vmem>>
      %77 = tpu.memref_slice %arg6[%10, %c0_i32_47] : memref<2x3x!tpu.dma_semaphore, #tpu.memory_space<semaphore_mem>> -> memref<1x1x!tpu.dma_semaphore, #tpu.memory_space<semaphore_mem>>
      %78 = tpu.memref_squeeze %77 : memref<1x1x!tpu.dma_semaphore, #tpu.memory_space<semaphore_mem>> -> memref<!tpu.dma_semaphore, #tpu.memory_space<semaphore_mem>>
      tpu.enqueue_dma source(%74 : memref<1x128xf32, #tpu.memory_space<any>>) target(%76 : memref<1x128xf32, #tpu.memory_space<vmem>>) target_semaphore(%78 : memref<!tpu.dma_semaphore, #tpu.memory_space<semaphore_mem>>)
      %c3_i32_51 = arith.constant 3 : i32
      %79 = arith.muli %65, %c3_i32_51 : i32
      %c1_i32_52 = arith.constant 1 : i32
      %80 = arith.addi %79, %c1_i32_52 : i32
      %81 = arith.index_cast %80 : i32 to index
      %82 = memref.load %arg2[%81] : memref<12xi32, #tpu.memory_space<smem>>
      %83 = arith.addi %67, %82 : i32
      %c1_i32_53 = arith.constant 1 : i32
      %c0_i32_54 = arith.constant 0 : i32
      %84 = tpu.memref_slice %arg3[%65, %83, %c0_i32_54] : memref<4x16x128xf32, #tpu.memory_space<any>> -> memref<1x1x128xf32, #tpu.memory_space<any>>
      %85 = tpu.memref_squeeze %84 : memref<1x1x128xf32, #tpu.memory_space<any>> -> memref<1x128xf32, #tpu.memory_space<any>>
      %c1_i32_55 = arith.constant 1 : i32
      %c0_i32_56 = arith.constant 0 : i32
      %86 = tpu.memref_slice %arg5[%10, %c1_i32_55, %c0_i32_56] : memref<2x3x128xf32, #tpu.memory_space<vmem>> -> memref<1x1x128xf32, #tpu.memory_space<vmem>>
      %87 = tpu.memref_squeeze %86 : memref<1x1x128xf32, #tpu.memory_space<vmem>> -> memref<1x128xf32, #tpu.memory_space<vmem>>
      %88 = tpu.memref_slice %arg6[%10, %c1_i32_53] : memref<2x3x!tpu.dma_semaphore, #tpu.memory_space<semaphore_mem>> -> memref<1x1x!tpu.dma_semaphore, #tpu.memory_space<semaphore_mem>>
      %89 = tpu.memref_squeeze %88 : memref<1x1x!tpu.dma_semaphore, #tpu.memory_space<semaphore_mem>> -> memref<!tpu.dma_semaphore, #tpu.memory_space<semaphore_mem>>
      tpu.enqueue_dma source(%85 : memref<1x128xf32, #tpu.memory_space<any>>) target(%87 : memref<1x128xf32, #tpu.memory_space<vmem>>) target_semaphore(%89 : memref<!tpu.dma_semaphore, #tpu.memory_space<semaphore_mem>>)
      %c3_i32_57 = arith.constant 3 : i32
      %90 = arith.muli %65, %c3_i32_57 : i32
      %c2_i32_58 = arith.constant 2 : i32
      %91 = arith.addi %90, %c2_i32_58 : i32
      %92 = arith.index_cast %91 : i32 to index
      %93 = memref.load %arg2[%92] : memref<12xi32, #tpu.memory_space<smem>>
      %94 = arith.addi %67, %93 : i32
      %c2_i32_59 = arith.constant 2 : i32
      %c0_i32_60 = arith.constant 0 : i32
      %95 = tpu.memref_slice %arg3[%65, %94, %c0_i32_60] : memref<4x16x128xf32, #tpu.memory_space<any>> -> memref<1x1x128xf32, #tpu.memory_space<any>>
      %96 = tpu.memref_squeeze %95 : memref<1x1x128xf32, #tpu.memory_space<any>> -> memref<1x128xf32, #tpu.memory_space<any>>
      %c2_i32_61 = arith.constant 2 : i32
      %c0_i32_62 = arith.constant 0 : i32
      %97 = tpu.memref_slice %arg5[%10, %c2_i32_61, %c0_i32_62] : memref<2x3x128xf32, #tpu.memory_space<vmem>> -> memref<1x1x128xf32, #tpu.memory_space<vmem>>
      %98 = tpu.memref_squeeze %97 : memref<1x1x128xf32, #tpu.memory_space<vmem>> -> memref<1x128xf32, #tpu.memory_space<vmem>>
      %99 = tpu.memref_slice %arg6[%10, %c2_i32_59] : memref<2x3x!tpu.dma_semaphore, #tpu.memory_space<semaphore_mem>> -> memref<1x1x!tpu.dma_semaphore, #tpu.memory_space<semaphore_mem>>
      %100 = tpu.memref_squeeze %99 : memref<1x1x!tpu.dma_semaphore, #tpu.memory_space<semaphore_mem>> -> memref<!tpu.dma_semaphore, #tpu.memory_space<semaphore_mem>>
      tpu.enqueue_dma source(%96 : memref<1x128xf32, #tpu.memory_space<any>>) target(%98 : memref<1x128xf32, #tpu.memory_space<vmem>>) target_semaphore(%100 : memref<!tpu.dma_semaphore, #tpu.memory_space<semaphore_mem>>)
    } else {
    }
    %c0_i32_10 = arith.constant 0 : i32
    %c0_i32_11 = arith.constant 0 : i32
    %c0_i32_12 = arith.constant 0 : i32
    %c0_i32_13 = arith.constant 0 : i32
    %21 = tpu.memref_slice %arg3[%c0_i32_10, %c0_i32_12, %c0_i32_13] : memref<4x16x128xf32, #tpu.memory_space<any>> -> memref<1x1x128xf32, #tpu.memory_space<any>>
    %22 = tpu.memref_squeeze %21 : memref<1x1x128xf32, #tpu.memory_space<any>> -> memref<1x128xf32, #tpu.memory_space<any>>
    %c0_i32_14 = arith.constant 0 : i32
    %c0_i32_15 = arith.constant 0 : i32
    %23 = tpu.memref_slice %arg5[%9, %c0_i32_14, %c0_i32_15] : memref<2x3x128xf32, #tpu.memory_space<vmem>> -> memref<1x1x128xf32, #tpu.memory_space<vmem>>
    %24 = tpu.memref_squeeze %23 : memref<1x1x128xf32, #tpu.memory_space<vmem>> -> memref<1x128xf32, #tpu.memory_space<vmem>>
    %25 = tpu.memref_slice %arg6[%9, %c0_i32_11] : memref<2x3x!tpu.dma_semaphore, #tpu.memory_space<semaphore_mem>> -> memref<1x1x!tpu.dma_semaphore, #tpu.memory_space<semaphore_mem>>
    %26 = tpu.memref_squeeze %25 : memref<1x1x!tpu.dma_semaphore, #tpu.memory_space<semaphore_mem>> -> memref<!tpu.dma_semaphore, #tpu.memory_space<semaphore_mem>>
    tpu.wait_dma2 semaphore(%26 : memref<!tpu.dma_semaphore, #tpu.memory_space<semaphore_mem>>) src(%22 : memref<1x128xf32, #tpu.memory_space<any>>) dst(%24 : memref<1x128xf32, #tpu.memory_space<vmem>>)
    %c0_i32_16 = arith.constant 0 : i32
    %c1_i32_17 = arith.constant 1 : i32
    %c0_i32_18 = arith.constant 0 : i32
    %c0_i32_19 = arith.constant 0 : i32
    %27 = tpu.memref_slice %arg3[%c0_i32_16, %c0_i32_18, %c0_i32_19] : memref<4x16x128xf32, #tpu.memory_space<any>> -> memref<1x1x128xf32, #tpu.memory_space<any>>
    %28 = tpu.memref_squeeze %27 : memref<1x1x128xf32, #tpu.memory_space<any>> -> memref<1x128xf32, #tpu.memory_space<any>>
    %c1_i32_20 = arith.constant 1 : i32
    %c0_i32_21 = arith.constant 0 : i32
    %29 = tpu.memref_slice %arg5[%9, %c1_i32_20, %c0_i32_21] : memref<2x3x128xf32, #tpu.memory_space<vmem>> -> memref<1x1x128xf32, #tpu.memory_space<vmem>>
    %30 = tpu.memref_squeeze %29 : memref<1x1x128xf32, #tpu.memory_space<vmem>> -> memref<1x128xf32, #tpu.memory_space<vmem>>
    %31 = tpu.memref_slice %arg6[%9, %c1_i32_17] : memref<2x3x!tpu.dma_semaphore, #tpu.memory_space<semaphore_mem>> -> memref<1x1x!tpu.dma_semaphore, #tpu.memory_space<semaphore_mem>>
    %32 = tpu.memref_squeeze %31 : memref<1x1x!tpu.dma_semaphore, #tpu.memory_space<semaphore_mem>> -> memref<!tpu.dma_semaphore, #tpu.memory_space<semaphore_mem>>
    tpu.wait_dma2 semaphore(%32 : memref<!tpu.dma_semaphore, #tpu.memory_space<semaphore_mem>>) src(%28 : memref<1x128xf32, #tpu.memory_space<any>>) dst(%30 : memref<1x128xf32, #tpu.memory_space<vmem>>)
    %c0_i32_22 = arith.constant 0 : i32
    %c2_i32_23 = arith.constant 2 : i32
    %c0_i32_24 = arith.constant 0 : i32
    %c0_i32_25 = arith.constant 0 : i32
    %33 = tpu.memref_slice %arg3[%c0_i32_22, %c0_i32_24, %c0_i32_25] : memref<4x16x128xf32, #tpu.memory_space<any>> -> memref<1x1x128xf32, #tpu.memory_space<any>>
    %34 = tpu.memref_squeeze %33 : memref<1x1x128xf32, #tpu.memory_space<any>> -> memref<1x128xf32, #tpu.memory_space<any>>
    %c2_i32_26 = arith.constant 2 : i32
    %c0_i32_27 = arith.constant 0 : i32
    %35 = tpu.memref_slice %arg5[%9, %c2_i32_26, %c0_i32_27] : memref<2x3x128xf32, #tpu.memory_space<vmem>> -> memref<1x1x128xf32, #tpu.memory_space<vmem>>
    %36 = tpu.memref_squeeze %35 : memref<1x1x128xf32, #tpu.memory_space<vmem>> -> memref<1x128xf32, #tpu.memory_space<vmem>>
    %37 = tpu.memref_slice %arg6[%9, %c2_i32_23] : memref<2x3x!tpu.dma_semaphore, #tpu.memory_space<semaphore_mem>> -> memref<1x1x!tpu.dma_semaphore, #tpu.memory_space<semaphore_mem>>
    %38 = tpu.memref_squeeze %37 : memref<1x1x!tpu.dma_semaphore, #tpu.memory_space<semaphore_mem>> -> memref<!tpu.dma_semaphore, #tpu.memory_space<semaphore_mem>>
    tpu.wait_dma2 semaphore(%38 : memref<!tpu.dma_semaphore, #tpu.memory_space<semaphore_mem>>) src(%34 : memref<1x128xf32, #tpu.memory_space<any>>) dst(%36 : memref<1x128xf32, #tpu.memory_space<vmem>>)
    %39 = arith.index_cast %arg0 : i32 to index
    %40 = memref.load %arg1[%39] : memref<4xi32, #tpu.memory_space<smem>>
    %c0_i32_28 = arith.constant 0 : i32
    %41 = arith.addi %40, %c0_i32_28 : i32
    %c0_i32_29 = arith.constant 0 : i32
    %c0_i32_30 = arith.constant 0 : i32
    %c0_i32_31 = arith.constant 0 : i32
    %42 = tpu.memref_slice %arg5[%9, %c0_i32_30, %c0_i32_31] : memref<2x3x128xf32, #tpu.memory_space<vmem>> -> memref<1x1x128xf32, #tpu.memory_space<vmem>>
    %43 = tpu.memref_squeeze %42 : memref<1x1x128xf32, #tpu.memory_space<vmem>> -> memref<1x128xf32, #tpu.memory_space<vmem>>
    %c0_i32_32 = arith.constant 0 : i32
    %44 = tpu.memref_slice %arg4[%arg0, %41, %c0_i32_32] : memref<4x16x128xf32, #tpu.memory_space<any>> -> memref<1x1x128xf32, #tpu.memory_space<any>>
    %45 = tpu.memref_squeeze %44 : memref<1x1x128xf32, #tpu.memory_space<any>> -> memref<1x128xf32, #tpu.memory_space<any>>
    %46 = tpu.memref_slice %arg7[%9, %c0_i32_29] : memref<2x3x!tpu.dma_semaphore, #tpu.memory_space<semaphore_mem>> -> memref<1x1x!tpu.dma_semaphore, #tpu.memory_space<semaphore_mem>>
    %47 = tpu.memref_squeeze %46 : memref<1x1x!tpu.dma_semaphore, #tpu.memory_space<semaphore_mem>> -> memref<!tpu.dma_semaphore, #tpu.memory_space<semaphore_mem>>
    tpu.enqueue_dma source(%43 : memref<1x128xf32, #tpu.memory_space<vmem>>) target(%45 : memref<1x128xf32, #tpu.memory_space<any>>) target_semaphore(%47 : memref<!tpu.dma_semaphore, #tpu.memory_space<semaphore_mem>>)
    %c1_i32_33 = arith.constant 1 : i32
    %48 = arith.addi %40, %c1_i32_33 : i32
    %c1_i32_34 = arith.constant 1 : i32
    %c1_i32_35 = arith.constant 1 : i32
    %c0_i32_36 = arith.constant 0 : i32
    %49 = tpu.memref_slice %arg5[%9, %c1_i32_35, %c0_i32_36] : memref<2x3x128xf32, #tpu.memory_space<vmem>> -> memref<1x1x128xf32, #tpu.memory_space<vmem>>
    %50 = tpu.memref_squeeze %49 : memref<1x1x128xf32, #tpu.memory_space<vmem>> -> memref<1x128xf32, #tpu.memory_space<vmem>>
    %c0_i32_37 = arith.constant 0 : i32
    %51 = tpu.memref_slice %arg4[%arg0, %48, %c0_i32_37] : memref<4x16x128xf32, #tpu.memory_space<any>> -> memref<1x1x128xf32, #tpu.memory_space<any>>
    %52 = tpu.memref_squeeze %51 : memref<1x1x128xf32, #tpu.memory_space<any>> -> memref<1x128xf32, #tpu.memory_space<any>>
    %53 = tpu.memref_slice %arg7[%9, %c1_i32_34] : memref<2x3x!tpu.dma_semaphore, #tpu.memory_space<semaphore_mem>> -> memref<1x1x!tpu.dma_semaphore, #tpu.memory_space<semaphore_mem>>
    %54 = tpu.memref_squeeze %53 : memref<1x1x!tpu.dma_semaphore, #tpu.memory_space<semaphore_mem>> -> memref<!tpu.dma_semaphore, #tpu.memory_space<semaphore_mem>>
    tpu.enqueue_dma source(%50 : memref<1x128xf32, #tpu.memory_space<vmem>>) target(%52 : memref<1x128xf32, #tpu.memory_space<any>>) target_semaphore(%54 : memref<!tpu.dma_semaphore, #tpu.memory_space<semaphore_mem>>)
    %c2_i32_38 = arith.constant 2 : i32
    %55 = arith.addi %40, %c2_i32_38 : i32
    %c2_i32_39 = arith.constant 2 : i32
    %c2_i32_40 = arith.constant 2 : i32
    %c0_i32_41 = arith.constant 0 : i32
    %56 = tpu.memref_slice %arg5[%9, %c2_i32_40, %c0_i32_41] : memref<2x3x128xf32, #tpu.memory_space<vmem>> -> memref<1x1x128xf32, #tpu.memory_space<vmem>>
    %57 = tpu.memref_squeeze %56 : memref<1x1x128xf32, #tpu.memory_space<vmem>> -> memref<1x128xf32, #tpu.memory_space<vmem>>
    %c0_i32_42 = arith.constant 0 : i32
    %58 = tpu.memref_slice %arg4[%arg0, %55, %c0_i32_42] : memref<4x16x128xf32, #tpu.memory_space<any>> -> memref<1x1x128xf32, #tpu.memory_space<any>>
    %59 = tpu.memref_squeeze %58 : memref<1x1x128xf32, #tpu.memory_space<any>> -> memref<1x128xf32, #tpu.memory_space<any>>
    %60 = tpu.memref_slice %arg7[%9, %c2_i32_39] : memref<2x3x!tpu.dma_semaphore, #tpu.memory_space<semaphore_mem>> -> memref<1x1x!tpu.dma_semaphore, #tpu.memory_space<semaphore_mem>>
    %61 = tpu.memref_squeeze %60 : memref<1x1x!tpu.dma_semaphore, #tpu.memory_space<semaphore_mem>> -> memref<!tpu.dma_semaphore, #tpu.memory_space<semaphore_mem>>
    tpu.enqueue_dma source(%57 : memref<1x128xf32, #tpu.memory_space<vmem>>) target(%59 : memref<1x128xf32, #tpu.memory_space<any>>) target_semaphore(%61 : memref<!tpu.dma_semaphore, #tpu.memory_space<semaphore_mem>>)
    %c3_i32 = arith.constant 3 : i32
    %62 = arith.cmpi eq, %arg0, %c3_i32 : i32
    %63 = arith.extui %62 : i1 to i32
    %c0_i32_43 = arith.constant 0 : i32
    %64 = arith.cmpi ne, %63, %c0_i32_43 : i32
    scf.if %64 {
      %c0_i32_44 = arith.constant 0 : i32
      %c0_i32_45 = arith.constant 0 : i32
      %c0_i32_46 = arith.constant 0 : i32
      %c0_i32_47 = arith.constant 0 : i32
      %65 = tpu.memref_slice %arg5[%9, %c0_i32_46, %c0_i32_47] : memref<2x3x128xf32, #tpu.memory_space<vmem>> -> memref<1x1x128xf32, #tpu.memory_space<vmem>>
      %66 = tpu.memref_squeeze %65 : memref<1x1x128xf32, #tpu.memory_space<vmem>> -> memref<1x128xf32, #tpu.memory_space<vmem>>
      %c0_i32_48 = arith.constant 0 : i32
      %c0_i32_49 = arith.constant 0 : i32
      %67 = tpu.memref_slice %arg4[%c0_i32_44, %c0_i32_48, %c0_i32_49] : memref<4x16x128xf32, #tpu.memory_space<any>> -> memref<1x1x128xf32, #tpu.memory_space<any>>
      %68 = tpu.memref_squeeze %67 : memref<1x1x128xf32, #tpu.memory_space<any>> -> memref<1x128xf32, #tpu.memory_space<any>>
      %69 = tpu.memref_slice %arg7[%9, %c0_i32_45] : memref<2x3x!tpu.dma_semaphore, #tpu.memory_space<semaphore_mem>> -> memref<1x1x!tpu.dma_semaphore, #tpu.memory_space<semaphore_mem>>
      %70 = tpu.memref_squeeze %69 : memref<1x1x!tpu.dma_semaphore, #tpu.memory_space<semaphore_mem>> -> memref<!tpu.dma_semaphore, #tpu.memory_space<semaphore_mem>>
      tpu.wait_dma2 semaphore(%70 : memref<!tpu.dma_semaphore, #tpu.memory_space<semaphore_mem>>) src(%66 : memref<1x128xf32, #tpu.memory_space<vmem>>) dst(%68 : memref<1x128xf32, #tpu.memory_space<any>>)
      %c0_i32_50 = arith.constant 0 : i32
      %c1_i32_51 = arith.constant 1 : i32
      %c1_i32_52 = arith.constant 1 : i32
      %c0_i32_53 = arith.constant 0 : i32
      %71 = tpu.memref_slice %arg5[%9, %c1_i32_52, %c0_i32_53] : memref<2x3x128xf32, #tpu.memory_space<vmem>> -> memref<1x1x128xf32, #tpu.memory_space<vmem>>
      %72 = tpu.memref_squeeze %71 : memref<1x1x128xf32, #tpu.memory_space<vmem>> -> memref<1x128xf32, #tpu.memory_space<vmem>>
      %c0_i32_54 = arith.constant 0 : i32
      %c0_i32_55 = arith.constant 0 : i32
      %73 = tpu.memref_slice %arg4[%c0_i32_50, %c0_i32_54, %c0_i32_55] : memref<4x16x128xf32, #tpu.memory_space<any>> -> memref<1x1x128xf32, #tpu.memory_space<any>>
      %74 = tpu.memref_squeeze %73 : memref<1x1x128xf32, #tpu.memory_space<any>> -> memref<1x128xf32, #tpu.memory_space<any>>
      %75 = tpu.memref_slice %arg7[%9, %c1_i32_51] : memref<2x3x!tpu.dma_semaphore, #tpu.memory_space<semaphore_mem>> -> memref<1x1x!tpu.dma_semaphore, #tpu.memory_space<semaphore_mem>>
      %76 = tpu.memref_squeeze %75 : memref<1x1x!tpu.dma_semaphore, #tpu.memory_space<semaphore_mem>> -> memref<!tpu.dma_semaphore, #tpu.memory_space<semaphore_mem>>
      tpu.wait_dma2 semaphore(%76 : memref<!tpu.dma_semaphore, #tpu.memory_space<semaphore_mem>>) src(%72 : memref<1x128xf32, #tpu.memory_space<vmem>>) dst(%74 : memref<1x128xf32, #tpu.memory_space<any>>)
      %c0_i32_56 = arith.constant 0 : i32
      %c2_i32_57 = arith.constant 2 : i32
      %c2_i32_58 = arith.constant 2 : i32
      %c0_i32_59 = arith.constant 0 : i32
      %77 = tpu.memref_slice %arg5[%9, %c2_i32_58, %c0_i32_59] : memref<2x3x128xf32, #tpu.memory_space<vmem>> -> memref<1x1x128xf32, #tpu.memory_space<vmem>>
      %78 = tpu.memref_squeeze %77 : memref<1x1x128xf32, #tpu.memory_space<vmem>> -> memref<1x128xf32, #tpu.memory_space<vmem>>
      %c0_i32_60 = arith.constant 0 : i32
      %c0_i32_61 = arith.constant 0 : i32
      %79 = tpu.memref_slice %arg4[%c0_i32_56, %c0_i32_60, %c0_i32_61] : memref<4x16x128xf32, #tpu.memory_space<any>> -> memref<1x1x128xf32, #tpu.memory_space<any>>
      %80 = tpu.memref_squeeze %79 : memref<1x1x128xf32, #tpu.memory_space<any>> -> memref<1x128xf32, #tpu.memory_space<any>>
      %81 = tpu.memref_slice %arg7[%9, %c2_i32_57] : memref<2x3x!tpu.dma_semaphore, #tpu.memory_space<semaphore_mem>> -> memref<1x1x!tpu.dma_semaphore, #tpu.memory_space<semaphore_mem>>
      %82 = tpu.memref_squeeze %81 : memref<1x1x!tpu.dma_semaphore, #tpu.memory_space<semaphore_mem>> -> memref<!tpu.dma_semaphore, #tpu.memory_space<semaphore_mem>>
      tpu.wait_dma2 semaphore(%82 : memref<!tpu.dma_semaphore, #tpu.memory_space<semaphore_mem>>) src(%78 : memref<1x128xf32, #tpu.memory_space<vmem>>) dst(%80 : memref<1x128xf32, #tpu.memory_space<any>>)
    } else {
    }
    return
  }
}

</mosaic_0001>

<bundles_post_ra>
// kernel: _permute_batched.1
= control target key start
LH: loop header
LB: loop body
LE: loop exit
PB: predicated region body
PF: predicated region fallthrough
CT: control target
= control target key end

     0   :  { %s1132_s0 = inlined_call_operand.vmem [shape: s32[4], index: 0, kind: input, shape index: {}]   ;;  %s1133_s2 = inlined_call_operand.hbm [shape: f32[4,16,128], index: 2, kind: input, shape index: {}, may-alias: {2,3}]   ;;  %s1134_s3 = inlined_call_operand.hbm [shape: f32[4,16,128], index: 3, kind: output, shape index: {}, may-alias: {2,3}]   ;;  %s1135_s1 = inlined_call_operand.vmem [shape: s32[12], index: 1, kind: input, shape index: {}]  }
   0x1   :  { %s8_s14 = sshll.u32 %s1132_s0, 4  ;;  %s12_s17 = sshll.u32 %s1135_s1, 4  ;;  %s9_s14 = int_to_ptr.vmem [resolvable:$true] %s8_s14  ;;  %s13_s17 = int_to_ptr.vmem [resolvable:$true] %s12_s17 }
   0x2   :  { %s516_s18 = scalar_lea.vmem %s9_s14, 16  ;;  %p521_p1 = scmp.lt.s32.totalorder %s9_s14, %s9_s14 }
   0x3   :  { %p517_p0 = scmp.ne.s32.totalorder %s9_s14, %s516_s18  ;;  %p522_p2 = scmp.lt.s32.totalorder %s516_s18, %s516_s18 }
   0x5   :  { %p523_p3 = por %p522_p2, %p521_p1 }
   0x7   :  { %p524_p4 = pnand %p523_p3, %p517_p0 }
   0x9   :  { %527 = shalt.err (!%p524_p4)  }
   0xa   :  { %s807_s19 = smov [#allocation6]   ;;  %s528_s20 = scalar_lea.vmem %s13_s17, 16 }
   0xb   :  { %11 = dma.vmem_to_smem %s9_s14, 16, %s807_s19, [#allocation5] }
   0xc   :  { %p529_p5 = scmp.ne.s32.totalorder %s13_s17, %s528_s20  ;;  %p533_p6 = scmp.lt.s32.totalorder %s13_s17, %s13_s17 }
   0xd   :  { %p534_p7 = scmp.lt.s32.totalorder %s528_s20, %s528_s20 }
   0xf   :  { %p535_p8 = por %p534_p7, %p533_p6 }
  0x11   :  { %p536_p9 = pnand %p535_p8, %p529_p5 }
  0x13   :  { %539 = shalt.err (!%p536_p9)  }
  0x14   :  { %s808_s0 = smov [#allocation7]  }
  0x15   :  { %15 = dma.vmem_to_smem %s13_s17, 16, %s808_s0, [#allocation5] }
  0x16   :  { %771 = dma.done.wait [#allocation5], 32 }
  0x17   :  { %772 = vsyncadd [#allocation5], 4294967264 }
  0x18   :  { %17 = sfence }
  0x19   :  { %s838_s1 = smov 0  }
  0x1a LB: > { %s843_s21 = sld [smem:[#allocation6]]  ;;  %p25_p10 = scmp.lt.s32.totalorder %s805_s1, 0  ;;  %s805_s1 = sphi %s838_s1, %s1136_s1  }
  0x1b   : > { %s43_s22 = sld [smem:[#allocation7]]  ;;  %s26_s23 = ssub.s32 0, %s805_s1 }
  0x1c   : > { %s433_s24 = smin.u32 %s805_s1, %s26_s23  ;;  %p499_p11 = scmp.eq.s32.totalorder %s805_s1, 0 }
  0x1d   : > { %s28_s25 = sand.u32 1, %s433_s24   ;;  %s809_s28 = smov [#allocation2]  }
  0x1e   : > { %s29_s26 = ssub.s32 0, %s28_s25  ;;  %s54_s29 = sshll.u32 %s809_s28, 4  ;;  %s850_s29 = int_to_ptr.vmem [resolvable:$true] %s54_s29 }
  0x1f   : > { %s1138_s26 = smov (!%p25_p10, %s29_s26), %s28_s25  ;;  %p500_p13 = scmp.ge.s32.totalorder %s805_s1, 1 }
  0x20   : > { %p435_p12 = scmp.lt.s32.totalorder %s1138_s26, 0  ;;  %s35_s30 = sadd.s32 2, %s1138_s26 }
  0x21   : > { %s44_s27 = sadd.s32 %s43_s22, %s843_s21  ;;  %s864_s12 = scalar_lea.hbm %s1133_s2, 1024 }
  0x22   : > { %s437_s4 = sshll.u32 %s44_s27, 4  ;;  %s1140_s30 = smov (!%p435_p12, %s35_s30), %s1138_s26 }
  0x23   : > { %s46_s7 = scalar_lea.hbm %s1133_s2, %s437_s4  ;;  %s37_s8 = ssub.s32 1, %s1140_s30 }
  0x24   : > { %s540_s9 = scalar_lea.hbm %s46_s7, 16  ;;  %p545_p3 = scmp.lt.s32.totalorder %s46_s7, %s1133_s2 }
  0x25   : > { %p541_p0 = scmp.ne.s32.totalorder %s46_s7, %s540_s9  ;;  %p546_p4 = scmp.lt.s32.totalorder %s864_s12, %s540_s9 }
  0x27   : > { %p542_p1 = pnand %p541_p0, %p499_p11  ;;  %p547_p5 = por %p546_p4, %p545_p3 }
  0x29   : > { %p543_p2 = pneg %p542_p1 }
  0x2b   : > { %p548_p6 = pnand %p547_p5, %p543_p2 }
  0x2d   : > { %551 = shalt.err (!%p548_p6)  }
  0x2e   : > { %s552_s15 = scalar_lea.vmem %s850_s29, 16  ;;  %s875_s16 = scalar_lea.vmem %s850_s29, 128 }
  0x2f   : > { %p553_p7 = scmp.ne.s32.totalorder %s850_s29, %s552_s15  ;;  %p559_p10 = scmp.lt.s32.totalorder %s850_s29, %s850_s29 }
  0x30   : > { %p560_p12 = scmp.lt.s32.totalorder %s875_s16, %s552_s15 }
  0x31   : > { %p554_p8 = pnand %p553_p7, %p499_p11 }
  0x32   : > { %p561_p0 = por %p560_p12, %p559_p10 }
  0x33   : > { %p555_p9 = pneg %p554_p8 }
  0x35   : > { %p562_p1 = pnand %p561_p0, %p555_p9 }
  0x37   : > { %565 = shalt.err (!%p562_p1)  }
  0x38   : > { %476 = dma.hbm_to_vmem [thread:$0]  (%p499_p11), %s46_s7, 16, %s850_s29, [#allocation3] }
  0x39   : > { %s885_s17 = smul.u32 3, %s37_s8  ;;  %s438_s18 = sld [smem:[#allocation7 + $0x1]] }
  0x3a   : > { %s440_s19 = sld [smem:[#allocation7 + $0x2]]  ;;  %s810_s20 = smov [#allocation2 + $0x1]  }
  0x3b   : > { %s71_s0 = sshll.u32 %s810_s20, 4  ;;  %s811_s22 = smov [#allocation2 + $0x2]   ;;  %s72_s0 = int_to_ptr.vmem [resolvable:$true] %s71_s0 }
  0x3c   : > { %s88_s23 = sshll.u32 %s811_s22, 4  ;;  %s888_s23 = int_to_ptr.vmem [resolvable:$true] %s88_s23 }
  0x3f   : > { %s59_s24 = sadd.s32 %s438_s18, %s843_s21 }
  0x40   : > { %s439_s25 = sshll.u32 %s59_s24, 4  ;;  %s76_s26 = sadd.s32 %s440_s19, %s843_s21 }
  0x41   : > { %s61_s4 = scalar_lea.hbm %s1133_s2, %s439_s25  ;;  %s441_s5 = sshll.u32 %s76_s26, 4 }
  0x42   : > { %s566_s6 = scalar_lea.hbm %s61_s4, 16  ;;  %p571_p5 = scmp.lt.s32.totalorder %s61_s4, %s1133_s2 }
  0x43   : > { %p567_p2 = scmp.ne.s32.totalorder %s61_s4, %s566_s6  ;;  %p572_p6 = scmp.lt.s32.totalorder %s864_s12, %s566_s6 }
  0x45   : > { %p568_p3 = pnand %p567_p2, %p499_p11  ;;  %p573_p7 = por %p572_p6, %p571_p5 }
  0x47   : > { %p569_p4 = pneg %p568_p3 }
  0x49   : > { %p574_p8 = pnand %p573_p7, %p569_p4 }
  0x4b   : > { %577 = shalt.err (!%p574_p8)  }
  0x4c   : > { %s578_s10 = scalar_lea.vmem %s72_s0, 16  ;;  %p585_p0 = scmp.lt.s32.totalorder %s72_s0, %s850_s29 }
  0x4d   : > { %p579_p9 = scmp.ne.s32.totalorder %s72_s0, %s578_s10  ;;  %p586_p1 = scmp.lt.s32.totalorder %s875_s16, %s578_s10 }
  0x4f   : > { %p580_p10 = pnand %p579_p9, %p499_p11  ;;  %p587_p2 = por %p586_p1, %p585_p0 }
  0x51   : > { %p581_p12 = pneg %p580_p10 }
  0x53   : > { %p588_p3 = pnand %p587_p2, %p581_p12 }
  0x55   : > { %591 = shalt.err (!%p588_p3)  }
  0x56   : > { %477 = dma.hbm_to_vmem [thread:$0]  (%p499_p11), %s61_s4, 16, %s72_s0, [#allocation3 + $0x1] }
  0x57   : > { %s78_s13 = scalar_lea.hbm %s1133_s2, %s441_s5 }
  0x58   : > { %s592_s14 = scalar_lea.hbm %s78_s13, 16  ;;  %p597_p7 = scmp.lt.s32.totalorder %s78_s13, %s1133_s2 }
  0x59   : > { %p593_p4 = scmp.ne.s32.totalorder %s78_s13, %s592_s14  ;;  %p598_p8 = scmp.lt.s32.totalorder %s864_s12, %s592_s14 }
  0x5b   : > { %p594_p5 = pnand %p593_p4, %p499_p11  ;;  %p599_p9 = por %p598_p8, %p597_p7 }
  0x5d   : > { %p595_p6 = pneg %p594_p5 }
  0x5f   : > { %p600_p10 = pnand %p599_p9, %p595_p6 }
  0x61   : > { %603 = shalt.err (!%p600_p10)  }
  0x62   : > { %s604_s19 = scalar_lea.vmem %s888_s23, 16  ;;  %p611_p2 = scmp.lt.s32.totalorder %s888_s23, %s850_s29 }
  0x63   : > { %p605_p12 = scmp.ne.s32.totalorder %s888_s23, %s604_s19  ;;  %p612_p3 = scmp.lt.s32.totalorder %s875_s16, %s604_s19 }
  0x65   : > { %p606_p0 = pnand %p605_p12, %p499_p11  ;;  %p613_p4 = por %p612_p3, %p611_p2 }
  0x67   : > { %p607_p1 = pneg %p606_p0 }
  0x69   : > { %p614_p5 = pnand %p613_p4, %p607_p1 }
  0x6b   : > { %617 = shalt.err (!%p614_p5)  }
  0x6c   : > { %478 = dma.hbm_to_vmem [thread:$0]  (%p499_p11), %s78_s13, 16, %s888_s23, [#allocation3 + $0x2] }
  0x6d   : > { %s97_s20 = scalar_lea.sflag [#allocation4], %s885_s17 }
  0x6e   : > { %774 = dma.done.wait (%p500_p13), %s97_s20, 16 }
  0x6f   : > { %776 = vsyncadd (%p500_p13), %s97_s20, 4294967280  ;;  %s352_s0 = scalar_lea.sflag %s97_s20, 1 [#allocation4] }
  0x70   : > { %778 = dma.done.wait (%p500_p13), %s352_s0, 16 }
  0x71   : > { %780 = vsyncadd (%p500_p13), %s352_s0, 4294967280  ;;  %s355_s22 = scalar_lea.sflag %s97_s20, 2 [#allocation4] }
  0x72   : > { %782 = dma.done.wait (%p500_p13), %s355_s22, 16 }
  0x73   : > { %784 = vsyncadd (%p500_p13), %s355_s22, 4294967280  ;;  %s939_s23 = sadd.s32 1, %s805_s1   ;;  %s942_s24 = sshll.u32 %s805_s1, 4 }
  0x74   : > { %p443_p11 = scmp.ge.s32.totalorder %s939_s23, 4  ;;  %p501_p13 = scmp.lt.s32.totalorder %s939_s23, 4 }
  0x75   : > { %s115_s25 = smul.u32 3, %s939_s23  ;;  %s446_s26 = sshll.u32 %s37_s8, 2 }
  0x76   : > { %s484_s27 = scalar_select %p501_p13, [#allocation6], [#allocation28] }
  0x77   : > { %s485_s28 = scalar_select %p501_p13, %s939_s23, 0 }
  0x78   : > { %s486_s4 = scalar_select %p501_p13, [#allocation7], [#allocation29] }
  0x79   : > { %s956_s5 = sld [smem:[%s484_s27 + %s485_s28]]  ;;  %s137_s6 = sadd.s32 1, %s115_s25 }
  0x7a   : > { %s487_s7 = scalar_select %p501_p13, %s115_s25, 0 }
  0x7b   : > { %s489_s9 = scalar_select %p501_p13, [#allocation7], [#allocation30] }
  0x7c   : > { %s116_s10 = sld [smem:[%s486_s4 + %s487_s7]]  ;;  %s158_s21 = sadd.s32 2, %s115_s25 }
  0x7d   : > { %s1142_s6 = smov (!%p501_p13, %s137_s6), 0  ;;  %s1144_s21 = smov (!%p501_p13, %s158_s21), 0 }
  0x7e   : > { %s492_s8 = scalar_select %p501_p13, [#allocation7], [#allocation31] }
  0x7f   : > { %s966_s11 = sld [smem:[%s489_s9 + %s1142_s6]]  ;;  %s970_s13 = scalar_lea.vmem [#allocation2], %s446_s26 }
  0x80   : > { %s133_s14 = sshll.u32 %s970_s13, 4  ;;  %s973_s15 = sld [smem:[%s492_s8 + %s1144_s21]]  ;;  %s134_s14 = int_to_ptr.vmem [resolvable:$true] %s133_s14 }
  0x81   : > { %s978_s0 = scalar_lea.sflag [#allocation3], %s885_s17 }
  0x82   : > { %s356_s18 = sadd.s32 %s116_s10, %s956_s5  ;;  %s377_s22 = scalar_lea.sflag %s978_s0, 1 [#allocation3] }
  0x83   : > { %s358_s19 = sadd.s32 %s942_s24, %s356_s18  ;;  %s389_s26 = scalar_lea.sflag %s978_s0, 2 [#allocation3] }
  0x84   : > { %s445_s20 = sshll.u32 %s358_s19, 4 }
  0x85   : > { %s360_s28 = scalar_lea.hbm %s1133_s2, %s445_s20  ;;  %s366_s6 = sadd.s32 %s966_s11, %s956_s5 }
  0x86   : > { %s361_s4 = scalar_lea.hbm %s360_s28, 256  ;;  %s644_s7 = scalar_lea.hbm %s360_s28, 272 }
  0x87   : > { %p619_p6 = scmp.ne.s32.totalorder %s361_s4, %s644_s7  ;;  %p623_p9 = scmp.lt.s32.totalorder %s361_s4, %s1133_s2 }
  0x88   : > { %p624_p10 = scmp.lt.s32.totalorder %s864_s12, %s644_s7 }
  0x89   : > { %p620_p7 = pnand %p619_p6, %p501_p13 }
  0x8a   : > { %p625_p12 = por %p624_p10, %p623_p9 }
  0x8b   : > { %p621_p8 = pneg %p620_p7 }
  0x8d   : > { %p626_p0 = pnand %p625_p12, %p621_p8 }
  0x8f   : > { %629 = shalt.err (!%p626_p0)  }
  0x90   : > { %s630_s17 = scalar_lea.vmem %s134_s14, 16  ;;  %p637_p4 = scmp.lt.s32.totalorder %s134_s14, %s850_s29 }
  0x91   : > { %p631_p1 = scmp.ne.s32.totalorder %s134_s14, %s630_s17  ;;  %p638_p5 = scmp.lt.s32.totalorder %s875_s16, %s630_s17 }
  0x93   : > { %p632_p2 = pnand %p631_p1, %p501_p13  ;;  %p639_p6 = por %p638_p5, %p637_p4 }
  0x95   : > { %p633_p3 = pneg %p632_p2 }
  0x97   : > { %p640_p7 = pnand %p639_p6, %p633_p3 }
  0x99   : > { %643 = shalt.err (!%p640_p7)  }
  0x9a   : > { %488 = dma.hbm_to_vmem [thread:$0]  (%p501_p13), %s361_s4, 16, %s134_s14, %s978_s0 }
  0x9b   : > { %s368_s21 = sadd.s32 %s942_s24, %s366_s6  ;;  %s374_s8 = scalar_lea.vmem %s970_s13, 1 [#allocation2] }
  0x9c   : > { %s448_s11 = sshll.u32 %s368_s21, 4  ;;  %s154_s18 = sshll.u32 %s374_s8, 4  ;;  %s155_s18 = int_to_ptr.vmem [resolvable:$true] %s154_s18 }
  0x9d   : > { %s370_s25 = scalar_lea.hbm %s1133_s2, %s448_s11  ;;  %s378_s28 = sadd.s32 %s973_s15, %s956_s5 }
  0x9e   : > { %s371_s27 = scalar_lea.hbm %s370_s25, 256  ;;  %s671_s7 = scalar_lea.hbm %s370_s25, 272 }
  0x9f   : > { %p646_p8 = scmp.ne.s32.totalorder %s371_s27, %s671_s7  ;;  %p650_p12 = scmp.lt.s32.totalorder %s371_s27, %s1133_s2 }
  0xa0   : > { %p651_p0 = scmp.lt.s32.totalorder %s864_s12, %s671_s7 }
  0xa1   : > { %p647_p9 = pnand %p646_p8, %p501_p13 }
  0xa2   : > { %p652_p1 = por %p651_p0, %p650_p12 }
  0xa3   : > { %p648_p10 = pneg %p647_p9 }
  0xa5   : > { %p653_p2 = pnand %p652_p1, %p648_p10 }
  0xa7   : > { %656 = shalt.err (!%p653_p2)  }
  0xa8   : > { %s657_s14 = scalar_lea.vmem %s155_s18, 16  ;;  %p664_p6 = scmp.lt.s32.totalorder %s155_s18, %s850_s29 }
  0xa9   : > { %p658_p3 = scmp.ne.s32.totalorder %s155_s18, %s657_s14  ;;  %p665_p7 = scmp.lt.s32.totalorder %s875_s16, %s657_s14 }
  0xab   : > { %p659_p4 = pnand %p658_p3, %p501_p13  ;;  %p666_p8 = por %p665_p7, %p664_p6 }
  0xad   : > { %p660_p5 = pneg %p659_p4 }
  0xaf   : > { %p667_p9 = pnand %p666_p8, %p660_p5 }
  0xb1   : > { %670 = shalt.err (!%p667_p9)  }
  0xb2   : > { %491 = dma.hbm_to_vmem [thread:$0]  (%p501_p13), %s371_s27, 16, %s155_s18, %s377_s22 }
  0xb3   : > { %s380_s5 = sadd.s32 %s942_s24, %s378_s28  ;;  %s386_s15 = scalar_lea.vmem %s970_s13, 2 [#allocation2] }
  0xb4   : > { %s451_s4 = sshll.u32 %s380_s5, 4  ;;  %s175_s6 = sshll.u32 %s386_s15, 4  ;;  %s176_s6 = int_to_ptr.vmem [resolvable:$true] %s175_s6 }
  0xb5   : > { %s382_s8 = scalar_lea.hbm %s1133_s2, %s451_s4  ;;  %s453_s19 = sshll.u32 %s1140_s30, 2 }
  0xb6   : > { %s383_s11 = scalar_lea.hbm %s382_s8, 256  ;;  %s698_s20 = scalar_lea.hbm %s382_s8, 272 }
  0xb7   : > { %p673_p10 = scmp.ne.s32.totalorder %s383_s11, %s698_s20  ;;  %p677_p1 = scmp.lt.s32.totalorder %s383_s11, %s1133_s2 }
  0xb8   : > { %p678_p2 = scmp.lt.s32.totalorder %s864_s12, %s698_s20 }
  0xb9   : > { %p674_p12 = pnand %p673_p10, %p501_p13 }
  0xba   : > { %p679_p3 = por %p678_p2, %p677_p1 }
  0xbb   : > { %p675_p0 = pneg %p674_p12 }
  0xbd   : > { %p680_p4 = pnand %p679_p3, %p675_p0 }
  0xbf   : > { %683 = shalt.err (!%p680_p4)  }
  0xc0   : > { %s684_s13 = scalar_lea.vmem %s176_s6, 16  ;;  %p691_p8 = scmp.lt.s32.totalorder %s176_s6, %s850_s29 }
  0xc1   : > { %p685_p5 = scmp.ne.s32.totalorder %s176_s6, %s684_s13  ;;  %p692_p9 = scmp.lt.s32.totalorder %s875_s16, %s684_s13 }
  0xc3   : > { %p686_p6 = pnand %p685_p5, %p501_p13  ;;  %p693_p10 = por %p692_p9, %p691_p8 }
  0xc5   : > { %p687_p7 = pneg %p686_p6 }
  0xc7   : > { %p694_p12 = pnand %p693_p10, %p687_p7 }
  0xc9   : > { %697 = shalt.err (!%p694_p12)  }
  0xca   : > { %494 = dma.hbm_to_vmem [thread:$0]  (%p501_p13), %s383_s11, 16, %s176_s6, %s389_s26 }
  0xcb   : > { %s181_s12 = smul.u32 3, %s1140_s30  ;;  %s180_s22 = scalar_lea.vmem [#allocation2], %s453_s19 }
  0xcd   : > { %s182_s18 = scalar_lea.sflag [#allocation3], %s181_s12 }
  0xce   : > { %785 = dma.done.wait %s182_s18, 16 }
  0xcf   : > { %786 = vsyncadd %s182_s18, 4294967280  ;;  %s396_s27 = scalar_lea.vmem %s180_s22, 1 [#allocation2]  ;;  %s399_s28 = scalar_lea.sflag %s182_s18, 1 [#allocation3] }
  0xd0   : > { %787 = dma.done.wait %s399_s28, 16 }
  0xd1   : > { %788 = vsyncadd %s399_s28, 4294967280  ;;  %s402_s9 = scalar_lea.vmem %s180_s22, 2 [#allocation2]  ;;  %s405_s10 = scalar_lea.sflag %s182_s18, 2 [#allocation3] }
  0xd2   : > { %789 = dma.done.wait %s405_s10, 16 }
  0xd3   : > { %790 = vsyncadd %s405_s10, 4294967280  ;;  %s198_s14 = sld [smem:[#allocation6 + %s805_s1]]  ;;  %s211_s0 = sshll.u32 %s180_s22, 4  ;;  %s212_s0 = int_to_ptr.vmem [resolvable:$true] %s211_s0 }
  0xd4   : > { %s227_s30 = sshll.u32 %s396_s27, 4  ;;  %p502_p13 = scmp.eq.s32.totalorder %s805_s1, 3  ;;  %s1050_s30 = int_to_ptr.vmem [resolvable:$true] %s227_s30 }
  0xd5   : > { %s1044_s26 = scalar_lea.sflag [#allocation4], %s181_s12  ;;  %s243_s15 = sshll.u32 %s402_s9, 4  ;;  %s1060_s15 = int_to_ptr.vmem [resolvable:$true] %s243_s15 }
  0xd6   : > { %s1047_s5 = scalar_lea.sflag %s1044_s26, 1 [#allocation4]  ;;  %s1053_s17 = scalar_lea.sflag %s1044_s26, 2 [#allocation4] }
  0xd7   : > { %s699_s19 = scalar_lea.vmem %s212_s0, 16  ;;  %p704_p1 = scmp.lt.s32.totalorder %s212_s0, %s850_s29 }
  0xd8   : > { %p700_p0 = scmp.ne.s32.totalorder %s212_s0, %s699_s19  ;;  %p705_p2 = scmp.lt.s32.totalorder %s875_s16, %s699_s19 }
  0xd9   : > { %s200_s4 = sadd.s32 %s942_s24, %s198_s14 }
  0xda   : > { %s457_s6 = sshll.u32 %s200_s4, 4  ;;  %p706_p3 = por %p705_p2, %p704_p1 }
  0xdb   : > { %s1058_s11 = scalar_lea.hbm %s1134_s3, %s457_s6 }
  0xdc   : > { %p707_p4 = pnand %p706_p3, %p700_p0 }
  0xde   : > { %710 = shalt.err (!%p707_p4)  }
  0xdf   : > { %s711_s24 = scalar_lea.hbm %s1058_s11, 16  ;;  %s1069_s7 = scalar_lea.hbm %s1134_s3, 1024 }
  0xe0   : > { %p712_p5 = scmp.ne.s32.totalorder %s1058_s11, %s711_s24  ;;  %p714_p6 = scmp.lt.s32.totalorder %s1058_s11, %s1134_s3 }
  0xe1   : > { %p715_p7 = scmp.lt.s32.totalorder %s1069_s7, %s711_s24 }
  0xe3   : > { %p716_p8 = por %p715_p7, %p714_p6 }
  0xe5   : > { %p717_p9 = pnand %p716_p8, %p712_p5 }
  0xe7   : > { %720 = shalt.err (!%p717_p9)  }
  0xe8   : > { %214 = dma.vmem_to_hbm [thread:$0]  %s212_s0, 16, %s1058_s11, %s1044_s26 }
  0xe9   : > { %s1079_s22 = scalar_lea.hbm %s1058_s11, 32  ;;  %s721_s18 = scalar_lea.vmem %s1050_s30, 16 }
  0xea   : > { %p722_p10 = scmp.ne.s32.totalorder %s1050_s30, %s721_s18  ;;  %p726_p12 = scmp.lt.s32.totalorder %s1050_s30, %s850_s29 }
  0xeb   : > { %p727_p0 = scmp.lt.s32.totalorder %s875_s16, %s721_s18 }
  0xed   : > { %p728_p1 = por %p727_p0, %p726_p12 }
  0xef   : > { %p729_p2 = pnand %p728_p1, %p722_p10 }
  0xf1   : > { %732 = shalt.err (!%p729_p2)  }
  0xf2   : > { %p734_p3 = scmp.ne.s32.totalorder %s711_s24, %s1079_s22  ;;  %p736_p4 = scmp.lt.s32.totalorder %s711_s24, %s1134_s3 }
  0xf3   : > { %p737_p5 = scmp.lt.s32.totalorder %s1069_s7, %s1079_s22 }
  0xf5   : > { %p738_p6 = por %p737_p5, %p736_p4 }
  0xf7   : > { %p739_p7 = pnand %p738_p6, %p734_p3 }
  0xf9   : > { %742 = shalt.err (!%p739_p7)  }
  0xfa   : > { %230 = dma.vmem_to_hbm [thread:$0]  %s1050_s30, 16, %s711_s24, %s1047_s5 }
  0xfb   : > { %s744_s9 = scalar_lea.vmem %s1060_s15, 16  ;;  %p749_p9 = scmp.lt.s32.totalorder %s1060_s15, %s850_s29 }
  0xfc   : > { %p745_p8 = scmp.ne.s32.totalorder %s1060_s15, %s744_s9  ;;  %p750_p10 = scmp.lt.s32.totalorder %s875_s16, %s744_s9 }
  0xfe   : > { %p751_p12 = por %p750_p10, %p749_p9 }
 0x100   : > { %p752_p0 = pnand %p751_p12, %p745_p8 }
 0x102   : > { %755 = shalt.err (!%p752_p0)  }
 0x103   : > { %s766_s10 = scalar_lea.hbm %s1058_s11, 48  ;;  %p759_p2 = scmp.lt.s32.totalorder %s1079_s22, %s1134_s3 }
 0x104   : > { %p757_p1 = scmp.ne.s32.totalorder %s1079_s22, %s766_s10  ;;  %p760_p3 = scmp.lt.s32.totalorder %s1069_s7, %s766_s10 }
 0x106   : > { %p761_p4 = por %p760_p3, %p759_p2 }
 0x108   : > { %p762_p5 = pnand %p761_p4, %p757_p1 }
 0x10a   : > { %765 = shalt.err (!%p762_p5)  }
 0x10b   : > { %246 = dma.vmem_to_hbm [thread:$0]  %s1060_s15, 16, %s1079_s22, %s1053_s17 }
 0x10c   : > { %792 = dma.done.wait (%p502_p13), %s1044_s26, 16 }
 0x10d   : > { %794 = vsyncadd (%p502_p13), %s1044_s26, 4294967280 }
 0x10e   : > { %796 = dma.done.wait (%p502_p13), %s1047_s5, 16 }
 0x10f   : > { %798 = vsyncadd (%p502_p13), %s1047_s5, 4294967280 }
 0x110   : > { %800 = dma.done.wait (%p502_p13), %s1053_s17, 16 }
 0x111   : > { %802 = vsyncadd (%p502_p13), %s1053_s17, 4294967280  ;;  %s1136_s1 = smov %s939_s23  ;;  %22 = sbr.rel (!%p443_p11) target bundleno = 26 (0x1a), region = 112 }
 0x116   :  { %257 = vsyncmov [#allocation3] }
 0x119   :  { %s258_s29 = vpop.sfrf %257 }
 0x11a   :  { %p463_p6 = scmp.ne.s32.totalorder %s258_s29, 0 }
 0x11c   :  { %262 = shalt.err (%p463_p6)  }
 0x11d   :  { %264 = vsyncmov [#allocation3 + $0x1] }
 0x120   :  { %s265_s16 = vpop.sfrf %264 }
 0x121   :  { %p464_p7 = scmp.ne.s32.totalorder %s265_s16, 0 }
 0x123   :  { %269 = shalt.err (%p464_p7)  }
 0x124   :  { %271 = vsyncmov [#allocation3 + $0x2] }
 0x127   :  { %s272_s30 = vpop.sfrf %271 }
 0x128   :  { %p465_p8 = scmp.ne.s32.totalorder %s272_s30, 0 }
 0x12a   :  { %276 = shalt.err (%p465_p8)  }
 0x12b   :  { %278 = vsyncmov [#allocation3 + $0x3] }
 0x12e   :  { %s279_s1 = vpop.sfrf %278 }
 0x12f   :  { %p466_p13 = scmp.ne.s32.totalorder %s279_s1, 0 }
 0x131   :  { %283 = shalt.err (%p466_p13)  }
 0x132   :  { %285 = vsyncmov [#allocation3 + $0x4] }
 0x135   :  { %s286_s26 = vpop.sfrf %285 }
 0x136   :  { %p467_p9 = scmp.ne.s32.totalorder %s286_s26, 0 }
 0x138   :  { %290 = shalt.err (%p467_p9)  }
 0x139   :  { %292 = vsyncmov [#allocation3 + $0x5] }
 0x13c   :  { %s293_s2 = vpop.sfrf %292 }
 0x13d   :  { %p468_p11 = scmp.ne.s32.totalorder %s293_s2, 0 }
 0x13f   :  { %297 = shalt.err (%p468_p11)  }
 0x140   :  { %298 = vsyncmov [#allocation4] }
 0x143   :  { %s299_s3 = vpop.sfrf %298 }
 0x144   :  { %p469_p10 = scmp.ne.s32.totalorder %s299_s3, 0 }
 0x146   :  { %303 = shalt.err (%p469_p10)  }
 0x147   :  { %305 = vsyncmov [#allocation4 + $0x1] }
 0x14a   :  { %s306_s23 = vpop.sfrf %305 }
 0x14b   :  { %p470_p12 = scmp.ne.s32.totalorder %s306_s23, 0 }
 0x14d   :  { %310 = shalt.err (%p470_p12)  }
 0x14e   :  { %312 = vsyncmov [#allocation4 + $0x2] }
 0x151   :  { %s313_s5 = vpop.sfrf %312 }
 0x152   :  { %p471_p0 = scmp.ne.s32.totalorder %s313_s5, 0 }
 0x154   :  { %317 = shalt.err (%p471_p0)  }
 0x155   :  { %319 = vsyncmov [#allocation4 + $0x3] }
 0x158   :  { %s320_s15 = vpop.sfrf %319 }
 0x159   :  { %p472_p1 = scmp.ne.s32.totalorder %s320_s15, 0 }
 0x15b   :  { %324 = shalt.err (%p472_p1)  }
 0x15c   :  { %326 = vsyncmov [#allocation4 + $0x4] }
 0x15f   :  { %s327_s4 = vpop.sfrf %326 }
 0x160   :  { %p473_p2 = scmp.ne.s32.totalorder %s327_s4, 0 }
 0x162   :  { %331 = shalt.err (%p473_p2)  }
 0x163   :  { %333 = vsyncmov [#allocation4 + $0x5] }
 0x166   :  { %s334_s6 = vpop.sfrf %333 }
 0x167   :  { %p474_p3 = scmp.ne.s32.totalorder %s334_s6, 0 }
 0x169   :  { %338 = shalt.err (%p474_p3)  }

</bundles_post_ra>
